<compile_context>
chip_gen: v7x
topology: tpu7x:2x2x1
jax: 0.10.0
libtpu: 0.0.40
codegen_flags: <defaults>
</compile_context>

<pallas_src>
import math

import numpy as np
import jax
import jax.numpy as jnp
from jax import lax
from jax.experimental import pallas as pl
from jax.experimental.pallas import tpu as pltpu

NEG_SLOPE = 0.2
EPS = 1e-8


# ----------------------------- Pallas kernel ---------------------------------
def _generator_head_kernel(p_ref, s1_ref, d_ref, s2_ref, w1_ref, b1_ref, w2_ref, b2_ref,
                           out_ref):
    # p_ref  : (KKCin, B*HW) bf16  im2col patches, rows = (kh, kw, cin), cols = (b, h, w)
    # s1_ref : (Cin, B)      f32   EqualLinear scores for block 1 (per input channel)
    # d_ref  : (Cout, B)     f32   demodulation scale (host-computed, per sample & out channel)
    # s2_ref : (Cout, B)     f32   EqualLinear scores for to_rgb
    # w1_ref : (Cout, KKCin) bf16  base 3x3 conv weight (shared across samples)
    # b1_ref : (Cout, 1)     f32   style-block bias
    # w2_ref : (3, Cout)     bf16  1x1 to_rgb conv weight
    # b2_ref : (3, 1)        f32   to_rgb bias
    # out_ref: (B, CROWS, HW) f32  rows [0:Cout] = x1, rows [Cout:Cout+3] = rgb, rest = pad
    B, CROWS, HW = out_ref.shape
    Cout = w1_ref.shape[0]
    Cin = s1_ref.shape[0]
    KK = p_ref.shape[0] // Cin

    patches = p_ref[...]                                            # (KKCin, B*HW) bf16

    # --- StyleBlock 1 (3x3, demod): modulate the ACTIVATIONS, share the weight ---
    # scale per input channel, tiled over the 9 taps (free VPU filler under the MXU)
    s1_full = jnp.concatenate([s1_ref[...]] * KK, axis=0).astype(jnp.bfloat16)   # (KKCin, B)
    pmod = jnp.concatenate(
        [patches[:, b * HW:(b + 1) * HW] * s1_full[:, b:b + 1] for b in range(B)],
        axis=1)                                                     # (KKCin, B*HW) bf16

    # one wide bf16 MXU matmul across the whole batch (f32 accumulation)
    acc = jnp.dot(w1_ref[...], pmod, preferred_element_type=jnp.float32)         # (Cout, B*HW)

    # demodulation: per-(sample, cout) scale on the output rows/column-blocks
    d = d_ref[...]                                                  # (Cout, B)
    acc = jnp.concatenate(
        [acc[:, b * HW:(b + 1) * HW] * d[:, b:b + 1] for b in range(B)], axis=1)
    acc = acc + b1_ref[...]                                         # bias
    x1 = jnp.where(acc >= 0.0, acc, NEG_SLOPE * acc)                # LeakyReLU(0.2), no noise

    # --- fused to_rgb StyleBlock (1x1, no demod) on the resident x1 tile ---
    s2 = s2_ref[...]                                                # (Cout, B)
    x1m = jnp.concatenate(
        [(x1[:, b * HW:(b + 1) * HW] * s2[:, b:b + 1]).astype(jnp.bfloat16)
         for b in range(B)], axis=1)                                # (Cout, B*HW) bf16
    acc2 = jnp.dot(w2_ref[...], x1m, preferred_element_type=jnp.float32)          # (3, B*HW)
    acc2 = acc2 + b2_ref[...]
    rgb = jnp.where(acc2 >= 0.0, acc2, NEG_SLOPE * acc2)            # LeakyReLU(0.2)

    # --- single aligned output stream: [x1 ; rgb ; zero-pad] -> CROWS (multiple of 8) rows ---
    pad_rows = CROWS - (Cout + 3)
    parts = [x1, rgb]
    if pad_rows > 0:
        parts.append(jnp.zeros((pad_rows, x1.shape[1]), jnp.float32))
    combined = jnp.concatenate(parts, axis=0)                       # (CROWS, B*HW)
    for b in range(B):
        out_ref[b] = combined[:, b * HW:(b + 1) * HW]               # aligned (CROWS, HW) store


# ----------------------------- glue (plain JAX) -------------------------------
def generator_head_forward(params, x_nchw, w):
    """GeneratorHead.forward: returns (x, rgb), both NCHW like the PyTorch module."""
    a1_scaled, a1_b, c1_w, c1_b = params["style"]     # a1_scaled: (Dw, Cin)
    a2_scaled, a2_b, c2_w, c2_b = params["to_rgb"]    # c1_w: (Cout,Cin,3,3), c2_w: (3,Cout,1,1)

    B, Cin, H, W_sp = x_nchw.shape
    Cout = c1_w.shape[0]
    K = c1_w.shape[-1]
    KK = K * K
    HW = H * W_sp
    KKCin = KK * Cin
    CROWS = ((Cout + 3 + 7) // 8) * 8                 # x1 rows + rgb rows padded to 8-sublane
    pad = K // 2

    x = x_nchw.astype(jnp.float32)
    w = w.astype(jnp.float32)

    # --- tiny per-sample scalar work hoisted out of the kernel (EqualLinear + demod scale) ---
    s1 = w @ a1_scaled + a1_b[None, :]                               # (B, Cin)
    s2 = w @ a2_scaled + a2_b[None, :]                               # (B, Cout)
    c1_w = c1_w.astype(jnp.float32)
    w1_sq_sum = jnp.sum(c1_w ** 2, axis=(2, 3))                      # (Cout, Cin)
    d = lax.rsqrt((s1 ** 2) @ w1_sq_sum.T + EPS)                     # (B, Cout) demod scale

    # --- im2col directly in the transposed lane-dense layout (KKCin, B*HW), bf16 ---
    xp = jnp.pad(x, ((0, 0), (0, 0), (pad, pad), (pad, pad))) if pad else x
    xt = jnp.transpose(xp, (1, 0, 2, 3))                             # (Cin, B, H+2p, W+2p)
    rows = [xt[:, :, kh:kh + H, kw:kw + W_sp].reshape(Cin, B * HW)
            for kh in range(K) for kw in range(K)]
    patches = jnp.concatenate(rows, axis=0).astype(jnp.bfloat16)     # (KKCin, B*HW)

    w1_flat = jnp.transpose(c1_w, (0, 2, 3, 1)).reshape(Cout, KKCin)  # (kh,kw,cin) columns

    out = pl.pallas_call(
        _generator_head_kernel,
        out_shape=jax.ShapeDtypeStruct((B, CROWS, HW), jnp.float32),
        grid=(1,),                                                    # whole batch in one step
        in_specs=[
            pl.BlockSpec((KKCin, B * HW), lambda i: (0, 0)),          # patches
            pl.BlockSpec((Cin, B), lambda i: (0, 0)),                 # s1 (unreplicated)
            pl.BlockSpec((Cout, B), lambda i: (0, 0)),                # demod scale
            pl.BlockSpec((Cout, B), lambda i: (0, 0)),                # s2
            pl.BlockSpec((Cout, KKCin), lambda i: (0, 0)),            # conv1 weight (bf16)
            pl.BlockSpec((Cout, 1), lambda i: (0, 0)),                # bias 1
            pl.BlockSpec((3, Cout), lambda i: (0, 0)),                # conv2 weight (bf16)
            pl.BlockSpec((3, 1), lambda i: (0, 0)),                   # bias 2
        ],
        out_specs=pl.BlockSpec((B, CROWS, HW), lambda i: (0, 0, 0)),
        compiler_params=pltpu.CompilerParams(dimension_semantics=("arbitrary",)),
    )(
        patches,
        s1.T,                                                         # (Cin, B)
        d.T,                                                          # (Cout, B)
        s2.T,                                                         # (Cout, B)
        w1_flat.astype(jnp.bfloat16),
        c1_b.reshape(Cout, 1).astype(jnp.float32),
        c2_w.reshape(3, Cout).astype(jnp.bfloat16),
        c2_b.reshape(3, 1).astype(jnp.float32),
    )

    # Outputs are already flattened NCHW -> slice rows and reshape, no transposes.
    x1 = out[:, :Cout, :].reshape(B, Cout, H, W_sp)
    rgb = out[:, Cout:Cout + 3, :].reshape(B, 3, H, W_sp)
    return x1, rgb


def init_generator_head_params(key, in_channels, out_channels, w_dim):
    """Deterministic synthetic params, shapes from GeneratorHead.__init__."""
    ks = jax.random.split(key, 4)
    # StyleBlock 1: EqualLinear(w_dim, in_channels, bias=1); ModulatedConv2D(in,out,3,pad=1,demod)
    a1_w = jax.random.normal(ks[0], (in_channels, w_dim), jnp.float32)
    a1_scaled = (a1_w * (1.0 / math.sqrt(w_dim))).T                              # (Dw, Cin)
    a1_b = jnp.ones((in_channels,), jnp.float32)
    c1_w = jax.random.normal(ks[1], (out_channels, in_channels, 3, 3), jnp.float32) \
        * (1.0 / math.sqrt(in_channels * 9))
    c1_b = jnp.zeros((out_channels,), jnp.float32)
    # StyleBlock 2 (to_rgb): EqualLinear(w_dim, out_channels, bias=1); ModulatedConv2D(out,3,1,no demod)
    a2_w = jax.random.normal(ks[2], (out_channels, w_dim), jnp.float32)
    a2_scaled = (a2_w * (1.0 / math.sqrt(w_dim))).T
    a2_b = jnp.ones((out_channels,), jnp.float32)
    c2_w = jax.random.normal(ks[3], (3, out_channels, 1, 1), jnp.float32) \
        * (1.0 / math.sqrt(out_channels))
    c2_b = jnp.zeros((3,), jnp.float32)
    return {
        "style": (a1_scaled, a1_b, c1_w, c1_b),
        "to_rgb": (a2_scaled, a2_b, c2_w, c2_b),
    }


# ----------------------------- pure-JAX reference -----------------------------
def _ref_style_block(x_nchw, w, params, *, pad, demod):
    aw_scaled, a_bias, conv_w, conv_b = params
    scores = w @ aw_scaled + a_bias[None, :]                                     # (B, Cin)

    def one(xb, sb):
        wmod = conv_w * sb[None, :, None, None]
        if demod:
            dd = lax.rsqrt(jnp.sum(wmod * wmod, axis=(1, 2, 3), keepdims=True) + EPS)
            wmod = wmod * dd
        y = lax.conv_general_dilated(
            xb[None], wmod, window_strides=(1, 1), padding=[(pad, pad), (pad, pad)],
            dimension_numbers=("NCHW", "OIHW", "NCHW"), precision=lax.Precision.HIGHEST)
        return y[0]

    y = jax.vmap(one)(x_nchw, scores) + conv_b[None, :, None, None]
    return jnp.where(y >= 0, y, NEG_SLOPE * y)


def _ref_generator_head(params, x_nchw, w):
    x1 = _ref_style_block(x_nchw, w, params["style"], pad=1, demod=True)
    rgb = _ref_style_block(x1, w, params["to_rgb"], pad=0, demod=False)
    return x1, rgb


# ----------------------------------- main -------------------------------------
if __name__ == "__main__":
    B, Cin, Cout, H, W_sp, Dw = 2, 4, 8, 16, 16, 32

    key = jax.random.PRNGKey(0)
    k_x, k_w, k_p = jax.random.split(key, 3)
    x = jax.random.normal(k_x, (B, Cin, H, W_sp), jnp.float32)   # NCHW, matches torch convention
    w = jax.random.normal(k_w, (B, Dw), jnp.float32)
    params = init_generator_head_params(k_p, Cin, Cout, Dw)

    x_out, rgb_out = jax.jit(generator_head_forward)(params, x, w)
    jax.block_until_ready((x_out, rgb_out))

    x_ref, rgb_ref = _ref_generator_head(params, x, w)
    assert x_out.shape == (B, Cout, H, W_sp) and rgb_out.shape == (B, 3, H, W_sp)
    # bf16 MXU inputs (patches, weights, x1 for to_rgb) vs the f32 HIGHEST-precision reference
    # give ~1e-2 scale differences; tolerances chosen accordingly.
    np.testing.assert_allclose(np.asarray(x_out), np.asarray(x_ref), rtol=2e-2, atol=3e-2)
    np.testing.assert_allclose(np.asarray(rgb_out), np.asarray(rgb_ref), rtol=2e-2, atol=3e-2)

    print("KERNEL_OK")
</pallas_src>

<mosaic_0001>
module attributes {stable_mosaic.version = 11 : i64} {
  func.func @_generator_head_kernel(%arg0: i32, %arg1: memref<36x512xbf16, #tpu.memory_space<vmem>>, %arg2: memref<4x2xf32, #tpu.memory_space<vmem>>, %arg3: memref<8x2xf32, #tpu.memory_space<vmem>>, %arg4: memref<8x2xf32, #tpu.memory_space<vmem>>, %arg5: memref<8x36xbf16, #tpu.memory_space<vmem>>, %arg6: memref<8x1xf32, #tpu.memory_space<vmem>>, %arg7: memref<3x8xbf16, #tpu.memory_space<vmem>>, %arg8: memref<3x1xf32, #tpu.memory_space<vmem>>, %arg9: memref<2x16x256xf32, #tpu.memory_space<vmem>>) attributes {dimension_semantics = [#tpu.dimension_semantics<arbitrary>], iteration_bounds = array<i64: 1>, scalar_prefetch = 0 : i64, scratch_operands = 0 : i64, tpu.core_type = #tpu.core_type<tc>, window_params = [{pipeline_mode = #tpu.pipeline_mode<synchronous>, transform_indices = @transform_0, window_bounds = array<i64: 36, 512>}, {pipeline_mode = #tpu.pipeline_mode<synchronous>, transform_indices = @transform_1, window_bounds = array<i64: 4, 2>}, {pipeline_mode = #tpu.pipeline_mode<synchronous>, transform_indices = @transform_2, window_bounds = array<i64: 8, 2>}, {pipeline_mode = #tpu.pipeline_mode<synchronous>, transform_indices = @transform_3, window_bounds = array<i64: 8, 2>}, {pipeline_mode = #tpu.pipeline_mode<synchronous>, transform_indices = @transform_4, window_bounds = array<i64: 8, 36>}, {pipeline_mode = #tpu.pipeline_mode<synchronous>, transform_indices = @transform_5, window_bounds = array<i64: 8, 1>}, {pipeline_mode = #tpu.pipeline_mode<synchronous>, transform_indices = @transform_6, window_bounds = array<i64: 3, 8>}, {pipeline_mode = #tpu.pipeline_mode<synchronous>, transform_indices = @transform_7, window_bounds = array<i64: 3, 1>}, {pipeline_mode = #tpu.pipeline_mode<synchronous>, transform_indices = @transform_8, window_bounds = array<i64: 2, 16, 256>}]} {
    %c0 = arith.constant 0 : index
    %c0_0 = arith.constant 0 : index
    %0 = vector.load %arg1[%c0, %c0_0] : memref<36x512xbf16, #tpu.memory_space<vmem>>, vector<36x512xbf16>
    %c0_1 = arith.constant 0 : index
    %c0_2 = arith.constant 0 : index
    %1 = vector.load %arg2[%c0_1, %c0_2] : memref<4x2xf32, #tpu.memory_space<vmem>>, vector<4x2xf32>
    %2 = tpu.concatenate %1, %1, %1, %1, %1, %1, %1, %1, %1 in 0 : vector<4x2xf32>, vector<4x2xf32>, vector<4x2xf32>, vector<4x2xf32>, vector<4x2xf32>, vector<4x2xf32>, vector<4x2xf32>, vector<4x2xf32>, vector<4x2xf32> -> vector<36x2xf32>
    %3 = arith.truncf %2 : vector<36x2xf32> to vector<36x2xbf16>
    %4 = vector.extract_strided_slice %0 {offsets = [0, 0], sizes = [36, 256], strides = [1, 1]} : vector<36x512xbf16> to vector<36x256xbf16>
    %5 = vector.extract_strided_slice %3 {offsets = [0, 0], sizes = [36, 1], strides = [1, 1]} : vector<36x2xbf16> to vector<36x1xbf16>
    %6 = vector.broadcast %5 : vector<36x1xbf16> to vector<36x256xbf16>
    %7 = arith.mulf %4, %6 : vector<36x256xbf16>
    %8 = vector.extract_strided_slice %0 {offsets = [0, 256], sizes = [36, 256], strides = [1, 1]} : vector<36x512xbf16> to vector<36x256xbf16>
    %9 = vector.extract_strided_slice %3 {offsets = [0, 1], sizes = [36, 1], strides = [1, 1]} : vector<36x2xbf16> to vector<36x1xbf16>
    %10 = vector.broadcast %9 : vector<36x1xbf16> to vector<36x256xbf16>
    %11 = arith.mulf %8, %10 : vector<36x256xbf16>
    %12 = tpu.concatenate %7, %11 in 1 : vector<36x256xbf16>, vector<36x256xbf16> -> vector<36x512xbf16>
    %c0_3 = arith.constant 0 : index
    %c0_4 = arith.constant 0 : index
    %13 = vector.load %arg5[%c0_3, %c0_4] : memref<8x36xbf16, #tpu.memory_space<vmem>>, vector<8x36xbf16>
    %cst = arith.constant dense<0.000000e+00> : vector<8x512xf32>
    %14 = tpu.matmul %13, %12, %cst {dimension_numbers = #tpu.dot_dimension_numbers<[1], [0], [0], [1], [0, 0, 1, 1], [], []>} : vector<8x36xbf16>, vector<36x512xbf16>, vector<8x512xf32> -> vector<8x512xf32>
    %c0_5 = arith.constant 0 : index
    %c0_6 = arith.constant 0 : index
    %15 = vector.load %arg3[%c0_5, %c0_6] : memref<8x2xf32, #tpu.memory_space<vmem>>, vector<8x2xf32>
    %16 = vector.extract_strided_slice %14 {offsets = [0, 0], sizes = [8, 256], strides = [1, 1]} : vector<8x512xf32> to vector<8x256xf32>
    %17 = vector.extract_strided_slice %15 {offsets = [0, 0], sizes = [8, 1], strides = [1, 1]} : vector<8x2xf32> to vector<8x1xf32>
    %18 = vector.broadcast %17 : vector<8x1xf32> to vector<8x256xf32>
    %19 = arith.mulf %16, %18 : vector<8x256xf32>
    %20 = vector.extract_strided_slice %14 {offsets = [0, 256], sizes = [8, 256], strides = [1, 1]} : vector<8x512xf32> to vector<8x256xf32>
    %21 = vector.extract_strided_slice %15 {offsets = [0, 1], sizes = [8, 1], strides = [1, 1]} : vector<8x2xf32> to vector<8x1xf32>
    %22 = vector.broadcast %21 : vector<8x1xf32> to vector<8x256xf32>
    %23 = arith.mulf %20, %22 : vector<8x256xf32>
    %24 = tpu.concatenate %19, %23 in 1 : vector<8x256xf32>, vector<8x256xf32> -> vector<8x512xf32>
    %c0_7 = arith.constant 0 : index
    %c0_8 = arith.constant 0 : index
    %25 = vector.load %arg6[%c0_7, %c0_8] : memref<8x1xf32, #tpu.memory_space<vmem>>, vector<8x1xf32>
    %26 = vector.broadcast %25 : vector<8x1xf32> to vector<8x512xf32>
    %27 = arith.addf %24, %26 : vector<8x512xf32>
    %cst_9 = arith.constant 0.000000e+00 : f32
    %28 = vector.broadcast %cst_9 : f32 to vector<8x512xf32>
    %29 = arith.cmpf oge, %27, %28 : vector<8x512xf32>
    %cst_10 = arith.constant 2.000000e-01 : f32
    %30 = vector.broadcast %cst_10 : f32 to vector<8x512xf32>
    %31 = arith.mulf %30, %27 : vector<8x512xf32>
    %32 = arith.select %29, %27, %31 : vector<8x512xi1>, vector<8x512xf32>
    %c0_11 = arith.constant 0 : index
    %c0_12 = arith.constant 0 : index
    %33 = vector.load %arg4[%c0_11, %c0_12] : memref<8x2xf32, #tpu.memory_space<vmem>>, vector<8x2xf32>
    %34 = vector.extract_strided_slice %32 {offsets = [0, 0], sizes = [8, 256], strides = [1, 1]} : vector<8x512xf32> to vector<8x256xf32>
    %35 = vector.extract_strided_slice %33 {offsets = [0, 0], sizes = [8, 1], strides = [1, 1]} : vector<8x2xf32> to vector<8x1xf32>
    %36 = vector.broadcast %35 : vector<8x1xf32> to vector<8x256xf32>
    %37 = arith.mulf %34, %36 : vector<8x256xf32>
    %38 = arith.truncf %37 : vector<8x256xf32> to vector<8x256xbf16>
    %39 = vector.extract_strided_slice %32 {offsets = [0, 256], sizes = [8, 256], strides = [1, 1]} : vector<8x512xf32> to vector<8x256xf32>
    %40 = vector.extract_strided_slice %33 {offsets = [0, 1], sizes = [8, 1], strides = [1, 1]} : vector<8x2xf32> to vector<8x1xf32>
    %41 = vector.broadcast %40 : vector<8x1xf32> to vector<8x256xf32>
    %42 = arith.mulf %39, %41 : vector<8x256xf32>
    %43 = arith.truncf %42 : vector<8x256xf32> to vector<8x256xbf16>
    %44 = tpu.concatenate %38, %43 in 1 : vector<8x256xbf16>, vector<8x256xbf16> -> vector<8x512xbf16>
    %c0_13 = arith.constant 0 : index
    %c0_14 = arith.constant 0 : index
    %45 = vector.load %arg7[%c0_13, %c0_14] : memref<3x8xbf16, #tpu.memory_space<vmem>>, vector<3x8xbf16>
    %cst_15 = arith.constant dense<0.000000e+00> : vector<3x512xf32>
    %46 = tpu.matmul %45, %44, %cst_15 {dimension_numbers = #tpu.dot_dimension_numbers<[1], [0], [0], [1], [0, 0, 1, 1], [], []>} : vector<3x8xbf16>, vector<8x512xbf16>, vector<3x512xf32> -> vector<3x512xf32>
    %c0_16 = arith.constant 0 : index
    %c0_17 = arith.constant 0 : index
    %47 = vector.load %arg8[%c0_16, %c0_17] : memref<3x1xf32, #tpu.memory_space<vmem>>, vector<3x1xf32>
    %48 = vector.broadcast %47 : vector<3x1xf32> to vector<3x512xf32>
    %49 = arith.addf %46, %48 : vector<3x512xf32>
    %cst_18 = arith.constant 0.000000e+00 : f32
    %50 = vector.broadcast %cst_18 : f32 to vector<3x512xf32>
    %51 = arith.cmpf oge, %49, %50 : vector<3x512xf32>
    %cst_19 = arith.constant 2.000000e-01 : f32
    %52 = vector.broadcast %cst_19 : f32 to vector<3x512xf32>
    %53 = arith.mulf %52, %49 : vector<3x512xf32>
    %54 = arith.select %51, %49, %53 : vector<3x512xi1>, vector<3x512xf32>
    %cst_20 = arith.constant 0.000000e+00 : f32
    %55 = vector.broadcast %cst_20 : f32 to vector<5x512xf32>
    %56 = tpu.concatenate %32, %54, %55 in 0 : vector<8x512xf32>, vector<3x512xf32>, vector<5x512xf32> -> vector<16x512xf32>
    %57 = vector.extract_strided_slice %56 {offsets = [0, 0], sizes = [16, 256], strides = [1, 1]} : vector<16x512xf32> to vector<16x256xf32>
    %c0_21 = arith.constant 0 : index
    %c0_22 = arith.constant 0 : index
    %c0_23 = arith.constant 0 : index
    %58 = vector.load %arg9[%c0_21, %c0_22, %c0_23] : memref<2x16x256xf32, #tpu.memory_space<vmem>>, vector<1x16x256xf32>
    %59 = vector.shape_cast %58 : vector<1x16x256xf32> to vector<16x256xf32>
    %60 = vector.shape_cast %57 : vector<16x256xf32> to vector<1x16x256xf32>
    tpu.vector_store %arg9[%c0_21, %c0_22, %c0_23], %60 {strides = array<i32>} : memref<2x16x256xf32, #tpu.memory_space<vmem>>, vector<1x16x256xf32>,
    %61 = vector.extract_strided_slice %56 {offsets = [0, 256], sizes = [16, 256], strides = [1, 1]} : vector<16x512xf32> to vector<16x256xf32>
    %c1 = arith.constant 1 : index
    %c0_24 = arith.constant 0 : index
    %c0_25 = arith.constant 0 : index
    %62 = vector.load %arg9[%c1, %c0_24, %c0_25] : memref<2x16x256xf32, #tpu.memory_space<vmem>>, vector<1x16x256xf32>
    %63 = vector.shape_cast %62 : vector<1x16x256xf32> to vector<16x256xf32>
    %64 = vector.shape_cast %61 : vector<16x256xf32> to vector<1x16x256xf32>
    tpu.vector_store %arg9[%c1, %c0_24, %c0_25], %64 {strides = array<i32>} : memref<2x16x256xf32, #tpu.memory_space<vmem>>, vector<1x16x256xf32>,
    return
  }
  func.func @transform_0(%arg0: i32) -> (i32, i32) {
    %c0_i32 = arith.constant 0 : i32
    %c0_i32_0 = arith.constant 0 : i32
    %c0_i32_1 = arith.constant 0 : i32
    return %c0_i32, %c0_i32_0 : i32, i32
  }
  func.func @transform_1(%arg0: i32) -> (i32, i32) {
    %c0_i32 = arith.constant 0 : i32
    %c0_i32_0 = arith.constant 0 : i32
    %c0_i32_1 = arith.constant 0 : i32
    return %c0_i32, %c0_i32_0 : i32, i32
  }
  func.func @transform_2(%arg0: i32) -> (i32, i32) {
    %c0_i32 = arith.constant 0 : i32
    %c0_i32_0 = arith.constant 0 : i32
    %c0_i32_1 = arith.constant 0 : i32
    return %c0_i32, %c0_i32_0 : i32, i32
  }
  func.func @transform_3(%arg0: i32) -> (i32, i32) {
    %c0_i32 = arith.constant 0 : i32
    %c0_i32_0 = arith.constant 0 : i32
    %c0_i32_1 = arith.constant 0 : i32
    return %c0_i32, %c0_i32_0 : i32, i32
  }
  func.func @transform_4(%arg0: i32) -> (i32, i32) {
    %c0_i32 = arith.constant 0 : i32
    %c0_i32_0 = arith.constant 0 : i32
    %c0_i32_1 = arith.constant 0 : i32
    return %c0_i32, %c0_i32_0 : i32, i32
  }
  func.func @transform_5(%arg0: i32) -> (i32, i32) {
    %c0_i32 = arith.constant 0 : i32
    %c0_i32_0 = arith.constant 0 : i32
    %c0_i32_1 = arith.constant 0 : i32
    return %c0_i32, %c0_i32_0 : i32, i32
  }
  func.func @transform_6(%arg0: i32) -> (i32, i32) {
    %c0_i32 = arith.constant 0 : i32
    %c0_i32_0 = arith.constant 0 : i32
    %c0_i32_1 = arith.constant 0 : i32
    return %c0_i32, %c0_i32_0 : i32, i32
  }
  func.func @transform_7(%arg0: i32) -> (i32, i32) {
    %c0_i32 = arith.constant 0 : i32
    %c0_i32_0 = arith.constant 0 : i32
    %c0_i32_1 = arith.constant 0 : i32
    return %c0_i32, %c0_i32_0 : i32, i32
  }
  func.func @transform_8(%arg0: i32) -> (i32, i32, i32) {
    %c0_i32 = arith.constant 0 : i32
    %c0_i32_0 = arith.constant 0 : i32
    %c0_i32_1 = arith.constant 0 : i32
    %c0_i32_2 = arith.constant 0 : i32
    return %c0_i32, %c0_i32_0, %c0_i32_1 : i32, i32, i32
  }
}

</mosaic_0001>

<bundles_post_ra>
// kernel: generator_head_forward.1
= control target key start
LH: loop header
LB: loop body
LE: loop exit
PB: predicated region body
PF: predicated region fallthrough
CT: control target
= control target key end

     0   :  { %v499_v0 = vmov 0   ;;  %vm44_vm0 = vcmask 1043456   ;;  %v500_v6 = vmov 1   ;;  %v501_v10 = vmov 839922192   ;;  %s645_s1 = inlined_call_operand.vmem [shape: f32[4,2], index: 1, kind: input, shape index: {}]   ;;  %s646_s2 = inlined_call_operand.vmem [shape: f32[8,2], index: 2, kind: input, shape index: {}]   ;;  %s647_s5 = inlined_call_operand.vmem [shape: f32[8,1], index: 5, kind: input, shape index: {}]   ;;  %s648_s3 = inlined_call_operand.vmem [shape: f32[8,2], index: 3, kind: input, shape index: {}]   ;;  %s649_s0 = inlined_call_operand.vmem [shape: bf16[36,512], index: 0, kind: input, shape index: {}]   ;;  %s650_s4 = inlined_call_operand.vmem [shape: bf16[8,36], index: 4, kind: input, shape index: {}]   ;;  %s651_s7 = inlined_call_operand.vmem [shape: f32[3,1], index: 7, kind: input, shape index: {}]   ;;  %s652_s8 = inlined_call_operand.vmem [shape: f32[2,16,256], index: 8, kind: output, shape index: {}]   ;;  %s653_s6 = inlined_call_operand.vmem [shape: bf16[3,8], index: 6, kind: input, shape index: {}]  }
   0x1   :  { %491 = vset.pattern.permute.xlu0 %v499_v0  ;;  %v40_v1 = vld [vmem:[%s645_s1] sm:$0xf]  ;;  %493 = vset.pattern.permute.xlu1 %v499_v0  ;;  %v59_v11 = vunpack.c.l.s4 %v501_v10  ;;  %v61_v12 = vlaneseq  ;;  %v502_v13 = vmov 1985246804   ;;  %v36_v23 = vld [vmem:[%s649_s0 + $0x30] sm:$0xff]  ;;  %v35_v35 = vld [vmem:[%s649_s0 + $0x28] sm:$0xff] }
   0x2   :  { %v42_v2 = vrot.slane %v40_v1, 4  ;;  %v47_v3 = vpack.c.bf16 %v40_v1, %v40_v1  ;;  %224 = vmatprep.mubr.bf16.mxu0 %v499_v0  ;;  %265 = vmatprep.mubr.bf16.mxu1 %v499_v0  ;;  %v274_v7 = vld [vmem:[%s646_s2] sm:$0xff]  ;;  %v66_v14 = vunpack.c.l.s4 %v502_v13  ;;  %v32_v25 = vld [vmem:[%s649_s0 + $0x10] sm:$0xff]  ;;  %v37_v37 = vld [vmem:[%s649_s0 + $0x38] sm:$0xff]  ;;  %vm179_vm1 = vcmask 1041408  }
   0x3   :  { %v288_v8 = vld [vmem:[%s647_s5] sm:$0xff]  ;;  %v60_v15 = vunpack.c.0.s8 %v59_v11  ;;  %v62_v16 = vshrl.u32 %v61_v12, 7  ;;  %v31_v41 = vld [vmem:[%s649_s0 + $0x8] sm:$0xff]  ;;  %v33_v42 = vld [vmem:[%s649_s0 + $0x18] sm:$0xff]  ;;  %vm175_vm2 = vcmask 293888   ;;  %vm335_vm7 = vcmask 64512  }
   0x4   :  { %v45_v4 = vsel %vm44_vm0, %v40_v1, %v42_v2  ;;  %54 = vperm.xlu1 %493, %v47_v3   ;;  %v310_v9 = vld [vmem:[%s648_s3] sm:$0xff]  ;;  %v67_v17 = vunpack.c.0.s8 %v66_v14  ;;  %v39_v47 = vld [vmem:[%s649_s0 + $0x48] sm:$0x33]  ;;  %vm445_vm8 = vcmask 1042432  }
   0x5   :  { %v46_v5 = vpack.c.bf16 %v45_v4, %v45_v4  ;;  %v63_v18 = vsub.s32 %v60_v15, %v62_v16  ;;  %v34_v21 = vld [vmem:[%s649_s0 + $0x20] sm:$0xff] }
   0x6   :  { %v70_v19 = vsub.s32 %v67_v17, %v62_v16  ;;  %v30_v24 = vld [vmem:[%s649_s0] sm:$0xff] }
   0x7   :  { %50 = vperm.xlu0 %491, %v46_v5   ;;  %v38_v29 = vld [vmem:[%s649_s0 + $0x40] sm:$0x33] }
   0x8   :  { %494 = vset.pattern.permute.xlu1 %v500_v6  ;;  %v174_v63 = vld [vmem:[%s650_s4] sm:$0xf] }
   0x9   :  { %91 = vperm.xlu1 %494, %v47_v3   ;;  %v329_v2 = vld [vmem:[%s651_s7] sm:$0x7] }
   0xb   :  { %492 = vset.pattern.permute.xlu0 %v500_v6 }
   0xc   :  { %88 = vperm.xlu0 %492, %v46_v5  }
   0xd   :  { %495 = vset.pattern.permute.xlu1 %v499_v0 }
   0xe   :  { %277 = vperm.xlu1 %495, %v274_v7  }
  0x10   :  { %283 = vperm.xlu0 %492, %v274_v7  }
  0x12   :  { %291 = vperm.xlu1 %495, %v288_v8  }
  0x14   :  { %496 = vset.pattern.permute.xlu0 %v499_v0 }
  0x15   :  { %313 = vperm.xlu0 %496, %v310_v9  }
  0x16   :  { %497 = vset.pattern.permute.xlu1 %v500_v6 }
  0x17   :  { %321 = vperm.xlu1 %497, %v310_v9  }
  0x1b   :  { %498 = vset.pattern.permute.xlu1 %v499_v0 }
  0x1c   :  { %332 = vperm.xlu1 %498, %v329_v2  }
  0x83   :  { %v55_v20 = vpop.permute.xlu1 %54 }
  0x84   :  { %v78_v28 = vrot.slane %v55_v20, %v63_v18 }
  0x86   :  { %v51_v22 = vpop.permute.xlu0 %50  ;;  %v86_v39 = vmul.bf16 %v78_v28, %v38_v29 }
  0x87   :  { %v64_v26 = vrot.slane %v51_v22, %v63_v18  ;;  %v71_v27 = vrot.slane %v51_v22, %v70_v19 }
  0x88   :  { %v92_v34 = vpop.permute.xlu1 %91  ;;  %v468_v52 = vcombine.high %v86_v39, %v86_v39  ;;  %v467_v53 = vcombine.low %v86_v39, %v86_v39 }
  0x89   :  { %v84_v30 = vmul.bf16 %v64_v26, %v34_v21  ;;  %v85_v31 = vmul.bf16 %v71_v27, %v36_v23  ;;  %v82_v32 = vmul.bf16 %v64_v26, %v30_v24  ;;  %v83_v33 = vmul.bf16 %v71_v27, %v32_v25 }
  0x8a   :  { %v115_v45 = vrot.slane %v92_v34, %v63_v18  ;;  %v181_v59 = vsel %vm179_vm1, %v467_v53, 0 }
  0x8b   :  { %v89_v36 = vpop.permute.xlu0 %88  ;;  %v464_v38 = vcombine.high %v82_v32, %v83_v33  ;;  %v463_v40 = vcombine.low %v82_v32, %v83_v33  ;;  %v466_v46 = vcombine.high %v84_v30, %v85_v31  ;;  %v465_v54 = vcombine.low %v84_v30, %v85_v31 }
  0x8c   :  { %v101_v43 = vrot.slane %v89_v36, %v63_v18  ;;  %v108_v44 = vrot.slane %v89_v36, %v70_v19  ;;  %v123_v56 = vmul.bf16 %v115_v45, %v39_v47 }
  0x8d   :  { %192 = vmatprep.subr.bf16.mxu0 %v464_v38  ;;  %v278_v3 = vpop.permute.xlu1 %277  ;;  %v328_v38 = vld [vmem:[%s653_s6] sm:$0x3] }
  0x8e   :  { %v121_v48 = vmul.bf16 %v101_v43, %v35_v35  ;;  %v122_v49 = vmul.bf16 %v108_v44, %v37_v37  ;;  %193 = vmatpush1.bf16.msra.mxu0 %v463_v40  ;;  %v119_v50 = vmul.bf16 %v101_v43, %v31_v41  ;;  %v120_v51 = vmul.bf16 %v108_v44, %v33_v42 }
  0x8f   :  { %194 = vmatprep.subr.bf16.mxu0 %v466_v46  ;;  %v474_v60 = vcombine.high %v123_v56, %v123_v56  ;;  %v473_v61 = vcombine.low %v123_v56, %v123_v56  ;;  %v284_v6 = vpop.permute.xlu0 %283 }
  0x90   :  { %v470_v55 = vcombine.high %v119_v50, %v120_v51  ;;  %v469_v57 = vcombine.low %v119_v50, %v120_v51  ;;  %v472_v58 = vcombine.high %v121_v48, %v122_v49  ;;  %v471_v62 = vcombine.low %v121_v48, %v122_v49 }
  0x91   :  { %v187_v1 = vsel %vm179_vm1, %v473_v61, 0  ;;  %v292_v5 = vpop.permute.xlu1 %291 }
  0x92   :  { %195 = vmatpush1.bf16.msra.mxu0 %v465_v54  ;;  %233 = vmatprep.subr.bf16.mxu1 %v470_v55 }
  0x93   :  { %234 = vmatpush1.bf16.msra.mxu1 %v469_v57  ;;  %475 = vmatprep.subr.msk.bf16.mxu0 %vm179_vm1, %v468_v52 }
  0x94   :  { %235 = vmatprep.subr.bf16.mxu1 %v472_v58  ;;  %v314_v15 = vpop.permute.xlu0 %313 }
  0x96   :  { %197 = vmatpush1.bf16.msra.mxu0 %v181_v59  ;;  %v322_v30 = vpop.permute.xlu1 %321 }
  0x97   :  { %236 = vmatpush1.bf16.msra.mxu1 %v471_v62 }
  0x98   :  { %477 = vmatprep.subr.msk.bf16.mxu1 %vm179_vm1, %v474_v60 }
  0x99   :  { %476 = vmatmul.mubr.msk.bf16.vlgmr.msra.gmra.mrb[0].mxu0 %vm175_vm2, %v174_v63 }
  0x9a   :  { %383 = vmatprep.mubr.bf16.mxu0 %v499_v0 }
  0x9b   :  { %238 = vmatpush1.bf16.msra.mxu1 %v187_v1  ;;  %v333_v42 = vpop.permute.xlu1 %332 }
  0x9e   :  { %478 = vmatmul.mubr.msk.bf16.vlgmr.msra.gmra.mrb[0].mxu1 %vm175_vm2, %v174_v63 }
  0x9f   :  { %424 = vmatprep.mubr.bf16.mxu1 %v499_v0 }
 0x16c   :  { %v226_v4 = vpop.f32.mrb[0].mxu0 }
 0x16d   :  { %v280_v7 = vmul.f32 %v278_v3, %v226_v4  ;;  %v228_v8 = vpop.f32.mrb[1].mxu0 }
 0x16e   :  { %v281_v9 = vmul.f32 %v278_v3, %v228_v8  ;;  %v230_v10 = vpop.f32.mrb[2].mxu0 }
 0x16f   :  { %v294_v11 = vadd.f32 %v292_v5, %v280_v7  ;;  %v231_v12 = vpop.f32.mrb[3].mxu0 }
 0x170   :  { %v295_v13 = vadd.f32 %v292_v5, %v281_v9 }
 0x171   :  { %v267_v14 = vpop.f32.mrb[0].mxu1  ;;  %vm298_vm3 = vcmp.ge.f32.partialorder %v294_v11, 0.0  ;;  %v302_v0 = vmul.f32 0.2, %v294_v11 }
 0x172   :  { %v286_v16 = vmul.f32 %v284_v6, %v267_v14  ;;  %v269_v17 = vpop.f32.mrb[1].mxu1  ;;  %vm299_vm4 = vcmp.ge.f32.partialorder %v295_v13, 0.0  ;;  %v303_v18 = vmul.f32 0.2, %v295_v13 }
 0x173   :  { %v287_v19 = vmul.f32 %v284_v6, %v269_v17  ;;  %v306_v20 = vsel %vm298_vm3, %v294_v11, %v302_v0  ;;  %v271_v21 = vpop.f32.mrb[2].mxu1 }
 0x174   :  { %v296_v22 = vadd.f32 %v292_v5, %v286_v16  ;;  %v307_v23 = vsel %vm299_vm4, %v295_v13, %v303_v18  ;;  %v316_v24 = vmul.f32 %v314_v15, %v306_v20  ;;  %450 = vst [vmem:[%s652_s8] sm:$0xff] %v306_v20  ;;  %v272_v25 = vpop.f32.mrb[3].mxu1 }
 0x175   :  { %v297_v26 = vadd.f32 %v292_v5, %v287_v19  ;;  %v317_v27 = vmul.f32 %v314_v15, %v307_v23  ;;  %451 = vst [vmem:[%s652_s8 + $0x8] sm:$0xff] %v307_v23 }
 0x176   :  { %v304_v28 = vmul.f32 0.2, %v296_v22  ;;  %v318_v29 = vpack.c.bf16 %v316_v24, %v316_v24  ;;  %vm300_vm5 = vcmp.ge.f32.partialorder %v296_v22, 0.0 }
 0x177   :  { %v305_v31 = vmul.f32 0.2, %v297_v26  ;;  %v319_v32 = vpack.c.bf16 %v317_v27, %v317_v27  ;;  %vm301_vm6 = vcmp.ge.f32.partialorder %v297_v26, 0.0 }
 0x178   :  { %v340_v33 = vsel %vm44_vm0, %v318_v29, 0  ;;  %v308_v34 = vsel %vm300_vm5, %v296_v22, %v304_v28 }
 0x179   :  { %v309_v35 = vsel %vm301_vm6, %v297_v26, %v305_v31  ;;  %v324_v36 = vmul.f32 %v322_v30, %v308_v34  ;;  %483 = vst [vmem:[%s652_s8 + $0x20] sm:$0xff] %v308_v34  ;;  %479 = vmatprep.subr.msk.bf16.mxu0 %vm44_vm0, %v319_v32 }
 0x17a   :  { %v325_v37 = vmul.f32 %v322_v30, %v309_v35  ;;  %484 = vst [vmem:[%s652_s8 + $0x28] sm:$0xff] %v309_v35  ;;  %352 = vmatpush1.bf16.msra.mxu0 %v340_v33 }
 0x17b   :  { %v326_v39 = vpack.c.bf16 %v324_v36, %v324_v36 }
 0x17c   :  { %v327_v40 = vpack.c.bf16 %v325_v37, %v325_v37 }
 0x17d   :  { %v346_v41 = vsel %vm44_vm0, %v326_v39, 0  ;;  %480 = vmatmul.mubr.msk.bf16.vlgmr.msra.gmra.mrb[4].mxu0 %vm335_vm7, %v328_v38 }
 0x17e   :  { %481 = vmatprep.subr.msk.bf16.mxu1 %vm44_vm0, %v327_v40 }
 0x17f   :  { %393 = vmatpush1.bf16.msra.mxu1 %v346_v41 }
 0x182   :  { %482 = vmatmul.mubr.msk.bf16.vlgmr.msra.gmra.mrb[4].mxu1 %vm335_vm7, %v328_v38 }
 0x250   :  { %v385_v43 = vpop.f32.mrb[4].mxu0 }
 0x251   :  { %v386_v44 = vadd.f32 %v385_v43, %v333_v42  ;;  %v387_v45 = vpop.f32.mrb[5].mxu0 }
 0x252   :  { %v388_v46 = vadd.f32 %v387_v45, %v333_v42  ;;  %v389_v47 = vpop.f32.mrb[6].mxu0 }
 0x253   :  { %vm433_vm9 = vcmp.ge.f32.partialorder %v386_v44, 0.0  ;;  %v437_v48 = vmul.f32 0.2, %v386_v44  ;;  %v390_v49 = vpop.f32.mrb[7].mxu0 }
 0x254   :  { %vm434_vm10 = vcmp.ge.f32.partialorder %v388_v46, 0.0  ;;  %v438_v50 = vmul.f32 0.2, %v388_v46 }
 0x255   :  { %v426_v51 = vpop.f32.mrb[4].mxu1  ;;  %v441_v52 = vsel %vm433_vm9, %v386_v44, %v437_v48 }
 0x256   :  { %v427_v53 = vadd.f32 %v426_v51, %v333_v42  ;;  %v446_v54 = vsel %vm445_vm8, %v441_v52, 0.0  ;;  %v442_v55 = vsel %vm434_vm10, %v388_v46, %v438_v50  ;;  %v428_v56 = vpop.f32.mrb[5].mxu1 }
 0x257   :  { %452 = vst [vmem:[%s652_s8 + $0x10] sm:$0xff] %v446_v54  ;;  %v447_v57 = vsel %vm445_vm8, %v442_v55, 0.0  ;;  %v429_v58 = vadd.f32 %v428_v56, %v333_v42  ;;  %v430_v59 = vpop.f32.mrb[6].mxu1 }
 0x258   :  { %vm435_vm11 = vcmp.ge.f32.partialorder %v427_v53, 0.0  ;;  %v439_v60 = vmul.f32 0.2, %v427_v53  ;;  %453 = vst [vmem:[%s652_s8 + $0x18] sm:$0xff] %v447_v57  ;;  %v431_v61 = vpop.f32.mrb[7].mxu1 }
 0x259   :  { %vm436_vm12 = vcmp.ge.f32.partialorder %v429_v58, 0.0  ;;  %v440_v62 = vmul.f32 0.2, %v429_v58 }
 0x25a   :  { %v443_v63 = vsel %vm435_vm11, %v427_v53, %v439_v60 }
 0x25b   :  { %v448_v1 = vsel %vm445_vm8, %v443_v63, 0.0  ;;  %v444_v2 = vsel %vm436_vm12, %v429_v58, %v440_v62 }
 0x25c   :  { %485 = vst [vmem:[%s652_s8 + $0x30] sm:$0xff] %v448_v1  ;;  %v449_v3 = vsel %vm445_vm8, %v444_v2, 0.0 }
 0x25d   :  { %486 = vst [vmem:[%s652_s8 + $0x38] sm:$0xff] %v449_v3 }

</bundles_post_ra>
